<compile_context>
chip_gen: v6e
topology: v6e:2x2x1
jax: 0.10.0
libtpu: 0.0.40
codegen_flags: <defaults>
</compile_context>

<pallas_src>
import functools

import jax
import jax.numpy as jnp
from jax.experimental import pallas as pl
from jax.experimental.pallas import tpu as pltpu

BN_EPS = 1e-5
LANE = 128
SUBLANE = 8


def _round_up(n, m):
    return ((n + m - 1) // m) * m


def _vmem_cap_bytes():
    """~7/8 of physical VMEM; conservative 56 MiB fallback (fits v7x)."""
    try:
        info = pltpu.get_tpu_info()
        phys = getattr(info, "vmem_capacity_bytes", None)
        if phys:
            return int(phys) * 7 // 8
    except Exception:
        pass
    return 56 << 20


# -----------------------------------------------------------------------------
# Kernel: one batch tile of the full 3-layer MLP (BN already folded into W/b).
# -----------------------------------------------------------------------------
def fcnn_kernel(x_ref, w1_ref, w2_ref, w3_ref, bias_ref, o_ref, *, h1p, h2p, c):
    cdt = w1_ref.dtype
    # cast under DMA/MXU slack; x is DMA'd once in its native dtype
    x = x_ref[...].astype(cdt)

    b1 = bias_ref[:, 0:h1p]
    b2 = bias_ref[:, h1p:h1p + h2p]
    b3 = bias_ref[:, h1p + h2p:h1p + h2p + c]

    # layer1 (+ folded batchnorm1) + ReLU   (dropout == identity in eval mode)
    h = jnp.dot(x, w1_ref[...], preferred_element_type=jnp.float32) + b1
    h = jnp.maximum(h, 0.0)

    # layer2 (+ folded batchnorm2) + ReLU
    h = jnp.dot(h.astype(cdt), w2_ref[...], preferred_element_type=jnp.float32) + b2
    h = jnp.maximum(h, 0.0)

    # output layer (true num_classes width; no output-lane padding)
    out = jnp.dot(h.astype(cdt), w3_ref[...], preferred_element_type=jnp.float32) + b3
    o_ref[...] = out.astype(o_ref.dtype)


# -----------------------------------------------------------------------------
# One-time parameter preparation: fold BN (eval mode), pad hidden dims to 128,
# cast weights to the compute dtype, concat biases. Call once per model.
# -----------------------------------------------------------------------------
def prepare_params(params, compute_dtype=jnp.bfloat16):
    F, H1 = params["w1"].shape
    H2 = params["w2"].shape[1]
    C = params["w3"].shape[1]
    H1p, H2p = _round_up(H1, LANE), _round_up(H2, LANE)

    # fold BatchNorm (running stats) into preceding Linear, in f32
    s1 = params["g1"] * jax.lax.rsqrt(params["v1"] + BN_EPS)            # (1, H1)
    w1 = params["w1"] * s1
    b1 = (params["b1"] - params["m1"]) * s1 + params["beta1"]
    s2 = params["g2"] * jax.lax.rsqrt(params["v2"] + BN_EPS)            # (1, H2)
    w2 = params["w2"] * s2
    b2 = (params["b2"] - params["m2"]) * s2 + params["beta2"]
    w3, b3 = params["w3"], params["b3"]

    def padc(a, cols):
        return jnp.pad(a, ((0, 0), (0, cols - a.shape[1])))

    def padrc(a, rows, cols):
        return jnp.pad(a, ((0, rows - a.shape[0]), (0, cols - a.shape[1])))

    w1p = padc(w1, H1p).astype(compute_dtype)            # (F,   H1p)  F unpadded
    w2p = padrc(w2, H1p, H2p).astype(compute_dtype)      # (H1p, H2p)
    w3p = padrc(w3, H2p, C).astype(compute_dtype)        # (H2p, C)    C unpadded
    biases = jnp.concatenate([padc(b1, H1p), padc(b2, H2p), b3],
                             axis=1).astype(jnp.float32)  # (1, H1p+H2p+C)

    return dict(w1=w1p, w2=w2p, w3=w3p, bias=biases, dims=(F, H1p, H2p, C))


# -----------------------------------------------------------------------------
# Forward: batch-tiled pallas_call over prepared params.
# -----------------------------------------------------------------------------
def fcnn_forward(x, prepared, *, tile_b=1024, min_steps=2):
    """x: (B, input_size). prepared: output of prepare_params()."""
    B, F = x.shape
    Fp, H1p, H2p, C = prepared["dims"]
    assert F == Fp, "x feature dim does not match prepared params"

    # --- batch tile: multiple of 8, minimal padding, >=min_steps when feasible ---
    n_steps = pl.cdiv(B, max(int(tile_b), SUBLANE))
    if B >= min_steps * SUBLANE:
        n_steps = max(n_steps, min_steps)          # keep both v7x TCs busy
    tile_B = _round_up(pl.cdiv(B, n_steps), SUBLANE)
    n_steps = pl.cdiv(B, tile_B)
    Bp = n_steps * tile_B

    xp = x if Bp == B else jnp.pad(x, ((0, Bp - B), (0, 0)))

    xo_depth = max(2, min(3, n_steps))             # deeper buffering on streamed refs

    # --- VMEM budget (Buffered(1) weights + xo_depth x/out buffers) ---
    w_item = jnp.dtype(prepared["w1"].dtype).itemsize
    x_item = jnp.dtype(x.dtype).itemsize
    weight_bytes = (F * H1p + H1p * H2p + H2p * C) * w_item + (H1p + H2p + C) * 4
    tile_bytes = tile_B * (F * x_item + C * 4)
    interm_bytes = tile_B * (H1p + H2p) * 4
    needed = weight_bytes + xo_depth * tile_bytes + interm_bytes + (2 << 20)
    vmem_limit = int(min(max(needed, 8 << 20), _vmem_cap_bytes()))

    flops = 2 * Bp * (F * H1p + H1p * H2p + H2p * C)
    bytes_accessed = Bp * F * x_item + weight_bytes + Bp * C * 4

    kernel = functools.partial(fcnn_kernel, h1p=H1p, h2p=H2p, c=C)

    out = pl.pallas_call(
        kernel,
        out_shape=jax.ShapeDtypeStruct((Bp, C), jnp.float32),
        grid=(n_steps,),
        in_specs=[
            # streamed x tile (feature dim = full last dim, no padding needed)
            pl.BlockSpec((tile_B, F), lambda i: (i, 0),
                         pipeline_mode=pl.Buffered(xo_depth)),
            # resident weights / biases: single-buffered (constant index_map)
            pl.BlockSpec((F, H1p), lambda i: (0, 0),
                         pipeline_mode=pl.Buffered(1)),
            pl.BlockSpec((H1p, H2p), lambda i: (0, 0),
                         pipeline_mode=pl.Buffered(1)),
            pl.BlockSpec((H2p, C), lambda i: (0, 0),
                         pipeline_mode=pl.Buffered(1)),
            pl.BlockSpec((1, H1p + H2p + C), lambda i: (0, 0),
                         pipeline_mode=pl.Buffered(1)),
        ],
        out_specs=pl.BlockSpec((tile_B, C), lambda i: (i, 0),
                               pipeline_mode=pl.Buffered(xo_depth)),
        compiler_params=pltpu.CompilerParams(
            dimension_semantics=("parallel",),
            vmem_limit_bytes=vmem_limit,
        ),
        cost_estimate=pl.CostEstimate(
            flops=flops, transcendentals=0, bytes_accessed=bytes_accessed),
    )(xp, prepared["w1"], prepared["w2"], prepared["w3"], prepared["bias"])

    return out[:B]


# -----------------------------------------------------------------------------
# Deterministic synthetic params + pure-JAX reference (unfused, eval mode).
# -----------------------------------------------------------------------------
def init_params(key, input_size, hidden1, hidden2, num_classes):
    ks = jax.random.split(key, 14)

    def lin(kw, kb, fan_in, fan_out):
        bound = 1.0 / jnp.sqrt(fan_in)
        w = jax.random.uniform(kw, (fan_in, fan_out), jnp.float32, -bound, bound)
        b = jax.random.uniform(kb, (1, fan_out), jnp.float32, -bound, bound)
        return w, b

    w1, b1 = lin(ks[0], ks[1], input_size, hidden1)
    w2, b2 = lin(ks[2], ks[3], hidden1, hidden2)
    w3, b3 = lin(ks[4], ks[5], hidden2, num_classes)

    def bn(kg, kb, km, kv, n):
        g = jax.random.uniform(kg, (1, n), jnp.float32, 0.5, 1.5)
        beta = 0.1 * jax.random.normal(kb, (1, n), jnp.float32)
        m = 0.1 * jax.random.normal(km, (1, n), jnp.float32)
        v = jax.random.uniform(kv, (1, n), jnp.float32, 0.5, 1.5)
        return g, beta, m, v

    g1, beta1, m1, v1 = bn(ks[6], ks[7], ks[8], ks[9], hidden1)
    g2, beta2, m2, v2 = bn(ks[10], ks[11], ks[12], ks[13], hidden2)

    return dict(w1=w1, b1=b1, g1=g1, beta1=beta1, m1=m1, v1=v1,
                w2=w2, b2=b2, g2=g2, beta2=beta2, m2=m2, v2=v2,
                w3=w3, b3=b3)


def fcnn_reference(x, params):
    h = x @ params["w1"] + params["b1"]
    h = (h - params["m1"]) / jnp.sqrt(params["v1"] + BN_EPS) * params["g1"] + params["beta1"]
    h = jnp.maximum(h, 0.0)
    h = h @ params["w2"] + params["b2"]
    h = (h - params["m2"]) / jnp.sqrt(params["v2"] + BN_EPS) * params["g2"] + params["beta2"]
    h = jnp.maximum(h, 0.0)
    return h @ params["w3"] + params["b3"]


if __name__ == "__main__":
    key = jax.random.PRNGKey(0)
    k_x, k_p = jax.random.split(key)

    batch = 8
    input_size = 32
    hidden1 = 64
    hidden2 = 32
    num_classes = 8

    x = jax.random.normal(k_x, (batch, input_size), jnp.float32)
    params = init_params(k_p, input_size, hidden1, hidden2, num_classes)
    ref = fcnn_reference(x, params)

    # Default path: bf16 operands, f32 MXU accumulation (loose tolerance).
    prep_bf16 = prepare_params(params, compute_dtype=jnp.bfloat16)
    out_bf16 = jax.block_until_ready(fcnn_forward(x, prep_bf16))
    assert out_bf16.shape == (batch, num_classes)
    assert jnp.allclose(out_bf16, ref, atol=1e-1, rtol=1e-1)

    # f32 path (tight-ish tolerance vs unfused reference).
    prep_f32 = prepare_params(params, compute_dtype=jnp.float32)
    out_f32 = jax.block_until_ready(fcnn_forward(x, prep_f32))
    assert out_f32.shape == (batch, num_classes)
    assert jnp.allclose(out_f32, ref, atol=5e-3, rtol=5e-3)

    # Multi-step grid + ragged batch padding path (tile_b forced small).
    x2 = jax.random.normal(k_x, (20, input_size), jnp.float32)
    ref2 = fcnn_reference(x2, params)
    out2 = jax.block_until_ready(fcnn_forward(x2, prep_f32, tile_b=8))
    assert out2.shape == (20, num_classes)
    assert jnp.allclose(out2, ref2, atol=5e-3, rtol=5e-3)

    print("KERNEL_OK")
</pallas_src>

<mosaic_0001>
module attributes {stable_mosaic.version = 11 : i64} {
  func.func @fcnn_kernel(%arg0: i32, %arg1: memref<8x32xf32, #tpu.memory_space<vmem>>, %arg2: memref<32x128xbf16, #tpu.memory_space<vmem>>, %arg3: memref<128x128xbf16, #tpu.memory_space<vmem>>, %arg4: memref<128x8xbf16, #tpu.memory_space<vmem>>, %arg5: memref<1x264xf32, #tpu.memory_space<vmem>>, %arg6: memref<8x8xf32, #tpu.memory_space<vmem>>) attributes {dimension_semantics = [#tpu.dimension_semantics<parallel>], iteration_bounds = array<i64: 1>, scalar_prefetch = 0 : i64, scratch_operands = 0 : i64, tpu.core_type = #tpu.core_type<tc>, window_params = [{pipeline_mode = #tpu.pipeline_mode<double_buffered>, transform_indices = @transform_0, window_bounds = array<i64: 8, 32>}, {pipeline_mode = #tpu.pipeline_mode<synchronous>, transform_indices = @transform_1, window_bounds = array<i64: 32, 128>}, {pipeline_mode = #tpu.pipeline_mode<synchronous>, transform_indices = @transform_2, window_bounds = array<i64: 128, 128>}, {pipeline_mode = #tpu.pipeline_mode<synchronous>, transform_indices = @transform_3, window_bounds = array<i64: 128, 8>}, {pipeline_mode = #tpu.pipeline_mode<synchronous>, transform_indices = @transform_4, window_bounds = array<i64: 1, 264>}, {pipeline_mode = #tpu.pipeline_mode<double_buffered>, transform_indices = @transform_5, window_bounds = array<i64: 8, 8>}]} {
    %c0 = arith.constant 0 : index
    %c0_0 = arith.constant 0 : index
    %0 = vector.load %arg1[%c0, %c0_0] : memref<8x32xf32, #tpu.memory_space<vmem>>, vector<8x32xf32>
    %1 = arith.truncf %0 : vector<8x32xf32> to vector<8x32xbf16>
    %c0_1 = arith.constant 0 : index
    %c0_2 = arith.constant 0 : index
    %2 = vector.load %arg5[%c0_1, %c0_2] : memref<1x264xf32, #tpu.memory_space<vmem>>, vector<1x128xf32>
    %c0_3 = arith.constant 0 : index
    %c128 = arith.constant 128 : index
    %3 = vector.load %arg5[%c0_3, %c128] : memref<1x264xf32, #tpu.memory_space<vmem>>, vector<1x128xf32>
    %c0_4 = arith.constant 0 : index
    %c256 = arith.constant 256 : index
    %4 = vector.load %arg5[%c0_4, %c256] : memref<1x264xf32, #tpu.memory_space<vmem>>, vector<1x8xf32>
    %c0_5 = arith.constant 0 : index
    %c0_6 = arith.constant 0 : index
    %5 = vector.load %arg2[%c0_5, %c0_6] : memref<32x128xbf16, #tpu.memory_space<vmem>>, vector<32x128xbf16>
    %cst = arith.constant dense<0.000000e+00> : vector<8x128xf32>
    %6 = tpu.matmul %1, %5, %cst {dimension_numbers = #tpu.dot_dimension_numbers<[1], [0], [0], [1], [0, 0, 1, 1], [], []>} : vector<8x32xbf16>, vector<32x128xbf16>, vector<8x128xf32> -> vector<8x128xf32>
    %7 = vector.broadcast %2 : vector<1x128xf32> to vector<8x128xf32>
    %8 = arith.addf %6, %7 : vector<8x128xf32>
    %cst_7 = arith.constant 0.000000e+00 : f32
    %9 = vector.broadcast %cst_7 : f32 to vector<8x128xf32>
    %10 = arith.maximumf %8, %9 : vector<8x128xf32>
    %11 = arith.truncf %10 : vector<8x128xf32> to vector<8x128xbf16>
    %c0_8 = arith.constant 0 : index
    %c0_9 = arith.constant 0 : index
    %12 = vector.load %arg3[%c0_8, %c0_9] : memref<128x128xbf16, #tpu.memory_space<vmem>>, vector<128x128xbf16>
    %cst_10 = arith.constant dense<0.000000e+00> : vector<8x128xf32>
    %13 = tpu.matmul %11, %12, %cst_10 {dimension_numbers = #tpu.dot_dimension_numbers<[1], [0], [0], [1], [0, 0, 1, 1], [], []>} : vector<8x128xbf16>, vector<128x128xbf16>, vector<8x128xf32> -> vector<8x128xf32>
    %14 = vector.broadcast %3 : vector<1x128xf32> to vector<8x128xf32>
    %15 = arith.addf %13, %14 : vector<8x128xf32>
    %cst_11 = arith.constant 0.000000e+00 : f32
    %16 = vector.broadcast %cst_11 : f32 to vector<8x128xf32>
    %17 = arith.maximumf %15, %16 : vector<8x128xf32>
    %18 = arith.truncf %17 : vector<8x128xf32> to vector<8x128xbf16>
    %c0_12 = arith.constant 0 : index
    %c0_13 = arith.constant 0 : index
    %19 = vector.load %arg4[%c0_12, %c0_13] : memref<128x8xbf16, #tpu.memory_space<vmem>>, vector<128x8xbf16>
    %cst_14 = arith.constant dense<0.000000e+00> : vector<8x8xf32>
    %20 = tpu.matmul %18, %19, %cst_14 {dimension_numbers = #tpu.dot_dimension_numbers<[1], [0], [0], [1], [0, 0, 1, 1], [], []>} : vector<8x128xbf16>, vector<128x8xbf16>, vector<8x8xf32> -> vector<8x8xf32>
    %21 = vector.broadcast %4 : vector<1x8xf32> to vector<8x8xf32>
    %22 = arith.addf %20, %21 : vector<8x8xf32>
    %c0_15 = arith.constant 0 : index
    %c0_16 = arith.constant 0 : index
    %23 = vector.load %arg6[%c0_15, %c0_16] : memref<8x8xf32, #tpu.memory_space<vmem>>, vector<8x8xf32>
    tpu.vector_store %arg6[%c0_15, %c0_16], %22 {strides = array<i32>} : memref<8x8xf32, #tpu.memory_space<vmem>>, vector<8x8xf32>,
    return
  }
  func.func @transform_0(%arg0: i32) -> (i32, i32) {
    %c0_i32 = arith.constant 0 : i32
    %c0_i32_0 = arith.constant 0 : i32
    return %arg0, %c0_i32 : i32, i32
  }
  func.func @transform_1(%arg0: i32) -> (i32, i32) {
    %c0_i32 = arith.constant 0 : i32
    %c0_i32_0 = arith.constant 0 : i32
    %c0_i32_1 = arith.constant 0 : i32
    return %c0_i32, %c0_i32_0 : i32, i32
  }
  func.func @transform_2(%arg0: i32) -> (i32, i32) {
    %c0_i32 = arith.constant 0 : i32
    %c0_i32_0 = arith.constant 0 : i32
    %c0_i32_1 = arith.constant 0 : i32
    return %c0_i32, %c0_i32_0 : i32, i32
  }
  func.func @transform_3(%arg0: i32) -> (i32, i32) {
    %c0_i32 = arith.constant 0 : i32
    %c0_i32_0 = arith.constant 0 : i32
    %c0_i32_1 = arith.constant 0 : i32
    return %c0_i32, %c0_i32_0 : i32, i32
  }
  func.func @transform_4(%arg0: i32) -> (i32, i32) {
    %c0_i32 = arith.constant 0 : i32
    %c0_i32_0 = arith.constant 0 : i32
    %c0_i32_1 = arith.constant 0 : i32
    return %c0_i32, %c0_i32_0 : i32, i32
  }
  func.func @transform_5(%arg0: i32) -> (i32, i32) {
    %c0_i32 = arith.constant 0 : i32
    %c0_i32_0 = arith.constant 0 : i32
    return %arg0, %c0_i32 : i32, i32
  }
}

</mosaic_0001>

<bundles_post_ra>
// kernel: tpu_custom_call.1
= control target key start
LH: loop header
LB: loop body
LE: loop exit
PB: predicated region body
PF: predicated region fallthrough
CT: control target
= control target key end

     0   :  { %10 = vsyncpa [#allocation3], 0  ;;  %s670_s0 = inlined_call_operand.hbm [shape: f32[8,32], index: 0, kind: input, shape index: {}]   ;;  %s671_s1 = inlined_call_operand.hbm [shape: bf16[32,128], index: 1, kind: input, shape index: {}]   ;;  %s672_s2 = inlined_call_operand.vmem [shape: bf16[128,128], index: 2, kind: input, shape index: {}]   ;;  %s673_s3 = inlined_call_operand.vmem [shape: bf16[128,8], index: 3, kind: input, shape index: {}]   ;;  %s674_s4 = inlined_call_operand.vmem [shape: f32[1,264], index: 4, kind: input, shape index: {}]   ;;  %s675_s5 = inlined_call_operand.hbm [shape: f32[8,8], index: 5, kind: output, shape index: {}]  }
   0x1   :  { %11 = vsyncpa [#allocation6], 0 }
   0x2   :  { %12 = vsyncpa [#allocation4], 0  ;;  %s543_s18 = smov [#allocation2]   ;;  %s544_s20 = smov [#allocation5]  }
   0x3   :  { %s19_s19 = sshll.u32 %s543_s18, 4  ;;  %s28_s21 = sshll.u32 %s544_s20, 4  ;;  %s20_s19 = int_to_ptr.vmem [resolvable:$true] %s19_s19  ;;  %s29_s21 = int_to_ptr.vmem [resolvable:$true] %s28_s21 }
   0x4   :  { %s485_s22 = scalar_lea.vmem %s20_s19, 128  ;;  %p490_p1 = scmp.lt.s32.totalorder %s20_s19, %s20_s19 }
   0x5   :  { %p486_p0 = scmp.ne.s32.totalorder %s20_s19, %s485_s22  ;;  %p491_p2 = scmp.lt.s32.totalorder %s485_s22, %s485_s22 }
   0x7   :  { %p492_p3 = por %p491_p2, %p490_p1 }
   0x9   :  { %p493_p4 = pnand %p492_p3, %p486_p0 }
   0xb   :  { %496 = shalt.err (!%p493_p4)
}
   0xc   :  { %22 = dma.hbm_to_vmem [thread:$0]  %s670_s0, 128, %s20_s19, [#allocation3]  }
   0xd   :  { %s505_s25 = scalar_lea.vmem %s29_s21, 256  ;;  %p510_p6 = scmp.lt.s32.totalorder %s29_s21, %s29_s21 }
   0xe   :  { %p506_p5 = scmp.ne.s32.totalorder %s29_s21, %s505_s25  ;;  %p511_p7 = scmp.lt.s32.totalorder %s505_s25, %s505_s25 }
  0x10   :  { %p512_p8 = por %p511_p7, %p510_p6 }
  0x12   :  { %p513_p9 = pnand %p512_p8, %p506_p5 }
  0x14   :  { %516 = shalt.err (!%p513_p9)
}
  0x15   :  { %s545_s26 = smov 64   ;;  %s546_s27 = smov 4  }
  0x16   :  { %34 = dma.hbm_to_vmem [thread:$0]  %s671_s1, 256, %s29_s21, [#allocation6], %s545_s26, %s545_s26, %s546_s27  }
  0x17   :  { %537 = dma.done.wait [#allocation3], 128  }
  0x18   :  { %538 = vsyncadd [#allocation3], 4294967168 }
  0x19   :  { %539 = dma.done.wait [#allocation6], 256  }
  0x1a   :  { %540 = vsyncadd [#allocation6], 4294967040  ;;  %v547_v0 = vmov 0.0   ;;  %vm548_vm0 = vmmov 0   ;;  %v459_v1 = vld [vmem:[#allocation5 + $0x8] sm:$0xff]   ;;  %v460_v2 = vld [vmem:[#allocation5] sm:$0xff]  }
  0x1b   :  { %404 = vmatprep.subr.bf16.mxu0 %v547_v0  ;;  %408 = vmatprep.mubr.msk.bf16.mxu0 %vm548_vm0, %v547_v0  ;;  %v48_v3 = vld [vmem:[#allocation2] sm:$0xff]  ;;  %v461_v4 = vld [vmem:[%s672_s2 + $0x38] sm:$0xff]   ;;  %v462_v6 = vld [vmem:[%s672_s2 + $0x30] sm:$0xff]   ;;  %vm75_vm1 = vcmask 261120   ;;  %s549_s13 = smov [#allocation7]   ;;  %vm343_vm2 = vcmask 64512  }
  0x1c   :  { %412 = vmatprep.subr.bf16.mxu1 %v547_v0  ;;  %428 = vmatprep.mubr.msk.bf16.mxu1 %vm548_vm0, %v547_v0  ;;  %v49_v5 = vpack.c.bf16 %v48_v3, %v48_v3  ;;  %v463_v7 = vld [vmem:[%s672_s2 + $0x28] sm:$0xff]   ;;  %v464_v8 = vld [vmem:[%s672_s2 + $0x20] sm:$0xff]   ;;  %v465_v9 = vld [vmem:[%s672_s2 + $0x18] sm:$0xff]   ;;  %s351_s14 = sshll.u32 %s549_s13, 4  ;;  %s352_s14 = int_to_ptr.vmem [resolvable:$true] %s351_s14 }
  0x1d   :  { %405 = vmatpush3.bf16.msra.mxu0 %v459_v1  ;;  %413 = vmatpush3.bf16.msra.mxu1 %v461_v4  ;;  %v466_v10 = vld [vmem:[%s672_s2 + $0x10] sm:$0xff]   ;;  %v467_v11 = vld [vmem:[%s672_s2 + $0x8] sm:$0xff]   ;;  %v468_v12 = vld [vmem:[%s672_s2] sm:$0xff]   ;;  %p522_p11 = scmp.lt.s32.totalorder %s352_s14, %s352_s14 }
  0x1e   :  { %406 = vmatprep.subr.bf16.mxu0 %v547_v0  ;;  %414 = vmatprep.subr.bf16.mxu1 %v547_v0  ;;  %v469_v13 = vld [vmem:[%s673_s3 + $0x38] sm:$0xff]   ;;  %v470_v14 = vld [vmem:[%s673_s3 + $0x30] sm:$0xff]   ;;  %v471_v15 = vld [vmem:[%s673_s3 + $0x28] sm:$0xff]  }
  0x1f   :  { %v472_v16 = vld [vmem:[%s673_s3 + $0x20] sm:$0xff]   ;;  %v473_v17 = vld [vmem:[%s673_s3 + $0x18] sm:$0xff]   ;;  %v474_v18 = vld [vmem:[%s673_s3 + $0x10] sm:$0xff]  }
  0x20   :  { %v361_v19 = vld [vmem:[%s674_s4] ss:$0 sm:$0xff]  ;;  %v475_v27 = vld [vmem:[%s673_s3 + $0x8] sm:$0xff]   ;;  %v365_v29 = vld [vmem:[%s674_s4 + $0x1] ss:$0 sm:$0xff] }
  0x21   :  { %407 = vmatpush3.bf16.msra.mxu0 %v460_v2  ;;  %415 = vmatpush3.bf16.msra.mxu1 %v462_v6  ;;  %v476_v28 = vld [vmem:[%s673_s3] sm:$0xff]   ;;  %s517_s3 = scalar_lea.vmem %s352_s14, 128 }
  0x22   :  { %432 = vmatprep.subr.bf16.mxu0 %v547_v0  ;;  %416 = vmatprep.subr.bf16.mxu1 %v547_v0  ;;  %v374_v37 = vld [vmem:[%s674_s4 + $0x2] ss:$0 sm:$0xff]  ;;  %p518_p10 = scmp.ne.s32.totalorder %s352_s14, %s517_s3  ;;  %p523_p12 = scmp.lt.s32.totalorder %s517_s3, %s517_s3 }
  0x24   :  { %409 = vmatmul.mubr.msk.bf16.vlgmr.msra.gmra.mxu0 %vm75_vm1, %v49_v5  ;;  %p524_p13 = por %p523_p12, %p522_p11 }
  0x25   :  { %448 = vmatprep.mubr.msk.bf16.mxu0 %vm548_vm0, %v547_v0  ;;  %417 = vmatpush3.bf16.msra.mxu1 %v463_v7 }
  0x26   :  { %418 = vmatprep.subr.bf16.mxu1 %v547_v0  ;;  %433 = vmatpush3.bf16.msra.mxu0 %v469_v13  ;;  %p525_p0 = pnand %p524_p13, %p518_p10 }
  0x27   :  { %434 = vmatprep.subr.bf16.mxu0 %v547_v0 }
  0x29   :  { %419 = vmatpush3.bf16.msra.mxu1 %v464_v8 }
  0x2a   :  { %420 = vmatprep.subr.bf16.mxu1 %v547_v0  ;;  %435 = vmatpush3.bf16.msra.mxu0 %v470_v14 }
  0x2b   :  { %436 = vmatprep.subr.bf16.mxu0 %v547_v0 }
  0x2d   :  { %421 = vmatpush3.bf16.msra.mxu1 %v465_v9 }
  0x2e   :  { %422 = vmatprep.subr.bf16.mxu1 %v547_v0  ;;  %437 = vmatpush3.bf16.msra.mxu0 %v471_v15 }
  0x2f   :  { %438 = vmatprep.subr.bf16.mxu0 %v547_v0 }
  0x31   :  { %423 = vmatpush3.bf16.msra.mxu1 %v466_v10 }
  0x32   :  { %424 = vmatprep.subr.bf16.mxu1 %v547_v0  ;;  %439 = vmatpush3.bf16.msra.mxu0 %v472_v16 }
  0x33   :  { %440 = vmatprep.subr.bf16.mxu0 %v547_v0 }
  0x35   :  { %425 = vmatpush3.bf16.msra.mxu1 %v467_v11 }
  0x36   :  { %426 = vmatprep.subr.bf16.mxu1 %v547_v0  ;;  %441 = vmatpush3.bf16.msra.mxu0 %v473_v17 }
  0x37   :  { %442 = vmatprep.subr.bf16.mxu0 %v547_v0 }
  0x39   :  { %427 = vmatpush3.bf16.msra.mxu1 %v468_v12 }
  0x3a   :  { %443 = vmatpush3.bf16.msra.mxu0 %v474_v18 }
  0x3b   :  { %444 = vmatprep.subr.bf16.mxu0 %v547_v0 }
  0x3e   :  { %445 = vmatpush3.bf16.msra.mxu0 %v475_v27 }
  0x3f   :  { %446 = vmatprep.subr.bf16.mxu0 %v547_v0 }
  0x42   :  { %447 = vmatpush3.bf16.msra.mxu0 %v476_v28 }
  0xe4   :  { %v113_v20 = vpop.f32.mrf.mxu0 }
  0xe5   :  { %v114_v21 = vadd.f32 %v361_v19, %v113_v20 }
  0xe6   :  { %v410_v22 = vpop.f32.mrf.mxu0 }
  0xe7   :  { %v119_v23 = vmax.f32 %v114_v21, 0.0 }
  0xe8   :  { %v116_v24 = vpop.f32.mrf.mxu0 }
  0xe9   :  { %v120_v25 = vpack.c.bf16 %v119_v23, %v119_v23 }
  0xea   :  { %v411_v26 = vpop.f32.mrf.mxu0 }
  0xeb   :  { %429 = vmatmul.mubr.bf16.vlgmr.msra.gmra.mxu1 %v120_v25 }
 0x1ab   :  { %v225_v30 = vpop.f32.mrf.mxu1 }
 0x1ac   :  { %v226_v31 = vadd.f32 %v365_v29, %v225_v30 }
 0x1ad   :  { %v430_v32 = vpop.f32.mrf.mxu1 }
 0x1ae   :  { %v231_v33 = vmax.f32 %v226_v31, 0.0 }
 0x1af   :  { %v228_v34 = vpop.f32.mrf.mxu1 }
 0x1b0   :  { %v232_v35 = vpack.c.bf16 %v231_v33, %v231_v33 }
 0x1b1   :  { %v431_v36 = vpop.f32.mrf.mxu1 }
 0x1b2   :  { %449 = vmatmul.mubr.bf16.vlgmr.msra.gmra.mxu0 %v232_v35 }
 0x272   :  { %v337_v38 = vpop.f32.mrf.mxu0 }
 0x273   :  { %v338_v39 = vadd.f32 %v374_v37, %v337_v38 }
 0x274   :  { %v450_v40 = vpop.f32.mrf.mxu0 }
 0x275   :  { %344 = vst.msk [vmem:[#allocation7] sm:$0xff] %vm343_vm2, %v338_v39 }
 0x276   :  { %v340_v41 = vpop.f32.mrf.mxu0 }
 0x277   :  { %528 = shalt.err (!%p525_p0)
}
 0x278   :  { %354 = dma.vmem_to_hbm [thread:$0]  %s352_s14, 128, %s675_s5, [#allocation4]   ;;  %v451_v42 = vpop.f32.mrf.mxu0 }
 0x279   :  { %541 = dma.done.wait [#allocation4], 128  }
 0x27a   :  { %542 = vsyncadd [#allocation4], 4294967168 }
 0x27b   :  { %358 = vsyncpa [#allocation3], 1 }
 0x27c   :  { %359 = vsyncpa [#allocation6], 1 }
 0x27d   :  { %360 = vsyncpa [#allocation4], 1 }

</bundles_post_ra>
